<compile_context>
chip_gen: v5e
topology: v5e:2x2
jax: 0.10.0
libtpu: 0.0.40
codegen_flags: <defaults>
</compile_context>

<pallas_src>
import functools

import jax
import jax.numpy as jnp
from jax.experimental import pallas as pl
from jax.experimental.pallas import tpu as pltpu


# ---------------------------------------------------------------------------
# small helpers
# ---------------------------------------------------------------------------
def _round_up(x, m):
    return ((x + m - 1) // m) * m


def _largest_divisor(n, cap, align):
    """Largest divisor of n that is <= cap and a multiple of `align`.
    Falls back to n itself (a full-dim block is always layout-legal); the
    callers assert the resulting VMEM footprint so the fallback can never
    silently blow the budget."""
    for d in range(min(n, cap), 0, -1):
        if n % d == 0 and d % align == 0:
            return d
    return n


# ---------------------------------------------------------------------------
# Pallas kernel 1: fused 3x3 conv (+bias+ReLU) via 9 in-kernel shifted matmuls
# ---------------------------------------------------------------------------
def _conv3x3_kernel(xf_ref, w_ref, b_ref, o_ref, *, wp, relu):
    # xf_ref: (1, (h+3)*(w+2), cinp)  flattened zero-padded image   (bf16)
    # w_ref : (9, cinp, cout)         one (cinp, cout) matrix per tap (bf16)
    # b_ref : (1, cout)                                              (f32)
    # o_ref : (1, h*(w+2), cout)      flattened output (2 junk cols / row)
    m = o_ref.shape[1]
    cout = o_ref.shape[2]
    acc = jnp.zeros((m, cout), jnp.float32)
    for ky in range(3):
        for kx in range(3):
            off = ky * wp + kx                      # constant tap offset
            xs = xf_ref[0, pl.ds(off, m), :]        # (m, cinp) shifted window
            acc = acc + jnp.dot(xs, w_ref[3 * ky + kx],
                                preferred_element_type=jnp.float32)
    r = acc + b_ref[...]                            # f32 epilogue
    if relu:
        r = jnp.maximum(r, 0.0)
    o_ref[0] = r.astype(o_ref.dtype)


def conv3x3_relu(x, w9, b2):
    """3x3 / stride 1 / pad 1 conv + bias + ReLU.
    x : (N, H, W, Cin) bf16/f32      w9: (9, CinP, Cout) bf16    b2: (1, Cout) f32
    """
    n, h, w, cin = x.shape
    _, cinp, cout = w9.shape
    wp = w + 2
    # Halo pad (1 on each side) + 1 extra bottom row so every constant-offset
    # tap window of the flattened image stays in bounds; zero-pad channels up
    # to the weight's padded Cin (multiple of 8).
    xp = jnp.pad(x.astype(jnp.bfloat16),
                 ((0, 0), (1, 2), (1, 1), (0, cinp - cin)))
    xf = xp.reshape(n, (h + 3) * wp, cinp)
    m = h * wp

    # VMEM budget check (double-buffered bf16 blocks + f32 accumulator).
    vmem = (2 * ((h + 3) * wp * cinp + 9 * cinp * cout + cout) * 2
            + 2 * m * cout * 2 + m * cout * 4)
    assert vmem < 24 * 1024 * 1024, ("conv block too large for VMEM", x.shape, cout)

    kernel = functools.partial(_conv3x3_kernel, wp=wp, relu=True)
    of = pl.pallas_call(
        kernel,
        out_shape=jax.ShapeDtypeStruct((n, m, cout), jnp.bfloat16),
        grid_spec=pltpu.PrefetchScalarGridSpec(
            num_scalar_prefetch=0,
            grid=(n,),
            in_specs=[
                pl.BlockSpec((1, (h + 3) * wp, cinp), lambda i: (i, 0, 0)),
                pl.BlockSpec((9, cinp, cout), lambda i: (0, 0, 0)),
                pl.BlockSpec((1, cout), lambda i: (0, 0)),
            ],
            out_specs=pl.BlockSpec((1, m, cout), lambda i: (i, 0, 0)),
        ),
        compiler_params=pltpu.CompilerParams(
            dimension_semantics=("parallel",),   # batch splits across v7x cores
        ),
    )(xf, w9, b2)
    # Drop the 2 junk columns per row introduced by the constant-offset trick.
    return of.reshape(n, h, wp, cout)[:, :, :w, :]


# ---------------------------------------------------------------------------
# Pallas kernel 2: tiled Linear  out = act(x @ w + b), f32 scratch accumulator
# ---------------------------------------------------------------------------
def _linear_kernel(x_ref, w_ref, b_ref, o_ref, acc_ref, *, relu):
    k = pl.program_id(2)

    @pl.when(k == 0)
    def _():
        acc_ref[...] = jnp.zeros_like(acc_ref)

    acc_ref[...] += jnp.dot(x_ref[...], w_ref[...],
                            preferred_element_type=jnp.float32)

    @pl.when(k == pl.num_programs(2) - 1)
    def _():
        r = acc_ref[...] + b_ref[...]
        if relu:
            r = jnp.maximum(r, 0.0)
        o_ref[...] = r.astype(o_ref.dtype)


def linear_bias_act(x, w, b, *, relu, out_dtype=jnp.bfloat16):
    """x: (M, K) bf16, w: (K, N) bf16, b: (1, N) f32."""
    M, K = x.shape
    Kw, N = w.shape
    assert K == Kw and b.shape == (1, N)

    tk = _largest_divisor(K, 2048, 128)       # big K tiles: weight streaming
    tn = _largest_divisor(N, 512, 128)
    if N // tn == 1 and tn % 256 == 0:
        tn //= 2                              # keep >=2 parallel N blocks (v7x)

    vmem = (2 * (M * tk + tk * tn + tn) * 2   # double-buffered bf16 blocks
            + 2 * M * tn * 2 + M * tn * 4)    # output bufs + f32 accumulator
    assert vmem < 24 * 1024 * 1024, ("linear tile too large for VMEM", M, K, N)

    grid = (M // M, N // tn, K // tk)
    kernel = functools.partial(_linear_kernel, relu=relu)
    return pl.pallas_call(
        kernel,
        out_shape=jax.ShapeDtypeStruct((M, N), out_dtype),
        grid_spec=pltpu.PrefetchScalarGridSpec(
            num_scalar_prefetch=0,
            grid=grid,
            in_specs=[
                pl.BlockSpec((M, tk), lambda i, j, k: (i, k)),
                pl.BlockSpec((tk, tn), lambda i, j, k: (k, j)),
                pl.BlockSpec((1, tn), lambda i, j, k: (0, j)),
            ],
            out_specs=pl.BlockSpec((M, tn), lambda i, j, k: (i, j)),
            scratch_shapes=[pltpu.VMEM((M, tn), jnp.float32)],
        ),
        compiler_params=pltpu.CompilerParams(
            dimension_semantics=("parallel", "parallel", "arbitrary"),
        ),
    )(x, w, b)


# ---------------------------------------------------------------------------
# glue
# ---------------------------------------------------------------------------
def maxpool2x2(x):
    # TODO(synk): 2x2 max-pool kept as plain-JAX glue inside the jitted graph.
    n, h, w, c = x.shape
    return x.reshape(n, h // 2, 2, w // 2, 2, c).max(axis=(2, 4))


# ---------------------------------------------------------------------------
# Model definition (layer structure matches the PyTorch module)
# ---------------------------------------------------------------------------
VGG_CFG = [(3, 64), (64, 64), "P",
           (64, 128), (128, 128), "P",
           (128, 256), (256, 256), (256, 256), "P",
           (256, 512), (512, 512), (512, 512), "P",
           (512, 512), (512, 512), (512, 512), "P"]

SOUND_CFG = [(1, 32), "P",
             (32, 64), "P",
             (64, 64), (64, 128), (128, 128), "P",
             (128, 256), (256, 256), (256, 512)]


def _prep_conv(w_hwio, b):
    """HWIO f32 weight -> (9, CinP, Cout) bf16 taps; bias -> (1, Cout) f32."""
    _, _, cin, cout = w_hwio.shape
    cinp = _round_up(cin, 8)
    w = jnp.pad(w_hwio, ((0, 0), (0, 0), (0, cinp - cin), (0, 0)))
    w9 = w.reshape(9, cinp, cout).astype(jnp.bfloat16)
    return w9, b.reshape(1, cout).astype(jnp.float32)


def _init_conv(key, cin, cout):
    kw, kb = jax.random.split(key)
    w = jax.random.normal(kw, (3, 3, cin, cout), jnp.float32) / jnp.sqrt(9.0 * cin)
    b = jax.random.normal(kb, (cout,), jnp.float32) * 0.01
    return _prep_conv(w, b)


def _init_linear(key, k, n):
    kw, kb = jax.random.split(key)
    w = (jax.random.normal(kw, (k, n), jnp.float32) / jnp.sqrt(float(k))
         ).astype(jnp.bfloat16)
    b = (jax.random.normal(kb, (n,), jnp.float32) * 0.01).reshape(1, n)
    return w, b


def _init_stream(key, cfg):
    ps = []
    for item in cfg:
        if item == "P":
            continue
        key, sub = jax.random.split(key)
        ps.append(_init_conv(sub, *item))
    return ps


def init_params(key, vis_hw, snd_hw):
    hs, ws = vis_hw[0] // 32, vis_hw[1] // 32   # visual streams: 5 max-pools
    sh, sw = snd_hw[0] // 8, snd_hw[1] // 8     # sound stream:   3 max-pools
    k1, k2, k3, k4, k5, k6, k7 = jax.random.split(key, 7)
    return {
        "still": _init_stream(k1, VGG_CFG),
        "optic": _init_stream(k2, VGG_CFG),
        "sound": _init_stream(k3, SOUND_CFG),
        # original: fc = Linear(512*2*11, 512); classifier = Linear(7*7*512*3, 4096)...
        "fc":   _init_linear(k4, 512 * sh * sw, 512),
        "cls1": _init_linear(k5, hs * ws * 512 * 3, 4096),
        "cls2": _init_linear(k6, 4096, 4096),
        "cls3": _init_linear(k7, 4096, 11),
    }


def _run_stream(x, cfg, params):
    it = iter(params)
    for item in cfg:
        if item == "P":
            x = maxpool2x2(x)
        else:
            w9, b2 = next(it)
            x = conv3x3_relu(x, w9, b2)
    return x


def forward(params, still, optic, sounds):
    # Inputs arrive NCHW (PyTorch convention) -> NHWC bf16 for the kernels.
    stl = jnp.transpose(still, (0, 2, 3, 1)).astype(jnp.bfloat16)
    opt = jnp.transpose(optic, (0, 2, 3, 1)).astype(jnp.bfloat16)
    snd = jnp.transpose(sounds, (0, 2, 3, 1)).astype(jnp.bfloat16)

    stl = _run_stream(stl, VGG_CFG, params["still"])     # (N, Hs, Ws, 512)
    opt = _run_stream(opt, VGG_CFG, params["optic"])     # (N, Hs, Ws, 512)
    snd = _run_stream(snd, SOUND_CFG, params["sound"])   # (N, sh, sw, 512)

    n, hs, ws, _ = stl.shape
    # PyTorch `.view(n, -1)` on NCHW tensors flattens in (C, H, W) order.
    stl_flat = jnp.transpose(stl, (0, 3, 1, 2)).reshape(n, -1)
    opt_flat = jnp.transpose(opt, (0, 3, 1, 2)).reshape(n, -1)
    snd_flat = jnp.transpose(snd, (0, 3, 1, 2)).reshape(n, -1)

    fw, fb = params["fc"]
    snd_fc = linear_bias_act(snd_flat, fw, fb, relu=False)           # (N, 512)
    # reshape(n,1,1,512).repeat(1,Hs,Ws,1).view(n,-1) -> flatten (h, w, c).
    snd_rep = jnp.broadcast_to(snd_fc[:, None, None, :],
                               (n, hs, ws, 512)).reshape(n, -1)

    z = jnp.concatenate([stl_flat, opt_flat, snd_rep], axis=1)

    # classifier: Linear+ReLU(+Dropout=identity), Linear+ReLU(+Dropout), Linear.
    w1, b1 = params["cls1"]
    w2, b2 = params["cls2"]
    w3, b3 = params["cls3"]
    z = linear_bias_act(z, w1, b1, relu=True)
    z = linear_bias_act(z, w2, b2, relu=True)
    z = linear_bias_act(z, w3, b3, relu=False, out_dtype=jnp.float32)
    return z


# ---------------------------------------------------------------------------
# Main
# ---------------------------------------------------------------------------
def _conv_ref(x_nhwc, w_hwio, b):
    y = jax.lax.conv_general_dilated(
        x_nhwc, w_hwio, window_strides=(1, 1), padding="SAME",
        dimension_numbers=("NHWC", "HWIO", "NHWC"),
        precision=jax.lax.Precision.HIGHEST)
    return jnp.maximum(y + b, 0.0)


if __name__ == "__main__":
    key = jax.random.PRNGKey(0)
    (k_param, k_still, k_optic, k_sound,
     k1, k2, k3, k4, k5, k6) = jax.random.split(key, 10)

    # ---- unit check: Pallas linear kernel vs plain JAX (bf16 operands) ----
    xs = jax.random.normal(k1, (8, 256), jnp.float32)
    ws = jax.random.normal(k2, (256, 128), jnp.float32) * 0.05
    bs = jax.random.normal(k3, (128,), jnp.float32) * 0.01
    got = linear_bias_act(xs.astype(jnp.bfloat16), ws.astype(jnp.bfloat16),
                          bs.reshape(1, -1), relu=True, out_dtype=jnp.float32)
    want = jnp.maximum(
        jnp.dot(xs.astype(jnp.bfloat16).astype(jnp.float32),
                ws.astype(jnp.bfloat16).astype(jnp.float32),
                precision=jax.lax.Precision.HIGHEST) + bs, 0.0)
    assert float(jnp.max(jnp.abs(got - want))) < 5e-2

    # ---- unit check: fused conv kernel vs lax.conv reference --------------
    xc = jax.random.normal(k4, (2, 8, 8, 3), jnp.float32)
    wc = jax.random.normal(k5, (3, 3, 3, 16), jnp.float32) * 0.1
    bc = jax.random.normal(k6, (16,), jnp.float32) * 0.01
    w9c, b2c = _prep_conv(wc, bc)
    got_c = conv3x3_relu(xc.astype(jnp.bfloat16), w9c, b2c).astype(jnp.float32)
    want_c = _conv_ref(xc.astype(jnp.bfloat16).astype(jnp.float32),
                       wc.astype(jnp.bfloat16).astype(jnp.float32), bc)
    assert float(jnp.max(jnp.abs(got_c - want_c))) < 5e-2

    # ---- scaled-down end-to-end forward -----------------------------------
    # 64x64 visual inputs -> 2x2x512 features (original 224x224 -> 7x7x512);
    # sound stays 16x88 -> 2x11x512 so fc is exactly Linear(512*2*11, 512).
    N = 2
    VIS_HW = (64, 64)
    SND_HW = (16, 88)

    params = init_params(k_param, VIS_HW, SND_HW)

    still = jax.random.normal(k_still, (N, 3, VIS_HW[0], VIS_HW[1]), jnp.float32)
    optic = jax.random.normal(k_optic, (N, 3, VIS_HW[0], VIS_HW[1]), jnp.float32)
    sounds = jax.random.normal(k_sound, (N, 1, SND_HW[0], SND_HW[1]), jnp.float32)

    fwd = jax.jit(forward)
    out = jax.block_until_ready(fwd(params, still, optic, sounds))

    assert out.shape == (N, 11)
    assert bool(jnp.all(jnp.isfinite(out)))
    print("KERNEL_OK")
</pallas_src>

<mosaic_0001>
module attributes {stable_mosaic.version = 11 : i64} {
  func.func @_linear_kernel(%arg0: i32, %arg1: i32, %arg2: i32, %arg3: memref<8x256xbf16, #tpu.memory_space<vmem>>, %arg4: memref<256x128xbf16, #tpu.memory_space<vmem>>, %arg5: memref<1x128xf32, #tpu.memory_space<vmem>>, %arg6: memref<8x128xf32, #tpu.memory_space<vmem>>, %arg7: memref<8x128xf32, #tpu.memory_space<vmem>>) attributes {dimension_semantics = [#tpu.dimension_semantics<parallel>, #tpu.dimension_semantics<parallel>, #tpu.dimension_semantics<arbitrary>], iteration_bounds = array<i64: 1, 1, 1>, scalar_prefetch = 0 : i64, scratch_operands = 1 : i64, tpu.core_type = #tpu.core_type<tc>, window_params = [{transform_indices = @transform_0, window_bounds = array<i64: 8, 256>}, {transform_indices = @transform_1, window_bounds = array<i64: 256, 128>}, {transform_indices = @transform_2, window_bounds = array<i64: 1, 128>}, {transform_indices = @transform_3, window_bounds = array<i64: 8, 128>}]} {
    %c0_i32 = arith.constant 0 : i32
    %0 = arith.cmpi eq, %arg2, %c0_i32 : i32
    %1 = arith.extui %0 : i1 to i32
    %c0_i32_0 = arith.constant 0 : i32
    %2 = arith.cmpi ne, %1, %c0_i32_0 : i32
    scf.if %2 {
      %cst_10 = arith.constant 0.000000e+00 : f32
      %12 = vector.broadcast %cst_10 : f32 to vector<8x128xf32>
      %c0_11 = arith.constant 0 : index
      %c0_12 = arith.constant 0 : index
      %13 = vector.load %arg7[%c0_11, %c0_12] : memref<8x128xf32, #tpu.memory_space<vmem>>, vector<8x128xf32>
      tpu.vector_store %arg7[%c0_11, %c0_12], %12 {strides = array<i32>} : memref<8x128xf32, #tpu.memory_space<vmem>>, vector<8x128xf32>,
    } else {
    }
    %c0 = arith.constant 0 : index
    %c0_1 = arith.constant 0 : index
    %3 = vector.load %arg7[%c0, %c0_1] : memref<8x128xf32, #tpu.memory_space<vmem>>, vector<8x128xf32>
    %c0_2 = arith.constant 0 : index
    %c0_3 = arith.constant 0 : index
    %4 = vector.load %arg3[%c0_2, %c0_3] : memref<8x256xbf16, #tpu.memory_space<vmem>>, vector<8x256xbf16>
    %c0_4 = arith.constant 0 : index
    %c0_5 = arith.constant 0 : index
    %5 = vector.load %arg4[%c0_4, %c0_5] : memref<256x128xbf16, #tpu.memory_space<vmem>>, vector<256x128xbf16>
    %cst = arith.constant dense<0.000000e+00> : vector<8x128xf32>
    %6 = tpu.matmul %4, %5, %cst {dimension_numbers = #tpu.dot_dimension_numbers<[1], [0], [0], [1], [0, 0, 1, 1], [], []>} : vector<8x256xbf16>, vector<256x128xbf16>, vector<8x128xf32> -> vector<8x128xf32>
    %7 = arith.addf %3, %6 : vector<8x128xf32>
    %c0_6 = arith.constant 0 : index
    %c0_7 = arith.constant 0 : index
    %8 = vector.load %arg7[%c0_6, %c0_7] : memref<8x128xf32, #tpu.memory_space<vmem>>, vector<8x128xf32>
    tpu.vector_store %arg7[%c0_6, %c0_7], %7 {strides = array<i32>} : memref<8x128xf32, #tpu.memory_space<vmem>>, vector<8x128xf32>,
    %c0_i32_8 = arith.constant 0 : i32
    %9 = arith.cmpi eq, %arg2, %c0_i32_8 : i32
    %10 = arith.extui %9 : i1 to i32
    %c0_i32_9 = arith.constant 0 : i32
    %11 = arith.cmpi ne, %10, %c0_i32_9 : i32
    scf.if %11 {
      %c0_10 = arith.constant 0 : index
      %c0_11 = arith.constant 0 : index
      %12 = vector.load %arg7[%c0_10, %c0_11] : memref<8x128xf32, #tpu.memory_space<vmem>>, vector<8x128xf32>
      %c0_12 = arith.constant 0 : index
      %c0_13 = arith.constant 0 : index
      %13 = vector.load %arg5[%c0_12, %c0_13] : memref<1x128xf32, #tpu.memory_space<vmem>>, vector<1x128xf32>
      %14 = vector.broadcast %13 : vector<1x128xf32> to vector<8x128xf32>
      %15 = arith.addf %12, %14 : vector<8x128xf32>
      %cst_14 = arith.constant 0.000000e+00 : f32
      %16 = vector.broadcast %cst_14 : f32 to vector<8x128xf32>
      %17 = arith.maximumf %15, %16 : vector<8x128xf32>
      %c0_15 = arith.constant 0 : index
      %c0_16 = arith.constant 0 : index
      %18 = vector.load %arg6[%c0_15, %c0_16] : memref<8x128xf32, #tpu.memory_space<vmem>>, vector<8x128xf32>
      tpu.vector_store %arg6[%c0_15, %c0_16], %17 {strides = array<i32>} : memref<8x128xf32, #tpu.memory_space<vmem>>, vector<8x128xf32>,
    } else {
    }
    return
  }
  func.func @transform_0(%arg0: i32, %arg1: i32, %arg2: i32) -> (i32, i32) {
    %c0_i32 = arith.constant 0 : i32
    return %arg0, %arg2 : i32, i32
  }
  func.func @transform_1(%arg0: i32, %arg1: i32, %arg2: i32) -> (i32, i32) {
    %c0_i32 = arith.constant 0 : i32
    return %arg2, %arg1 : i32, i32
  }
  func.func @transform_2(%arg0: i32, %arg1: i32, %arg2: i32) -> (i32, i32) {
    %c0_i32 = arith.constant 0 : i32
    %c0_i32_0 = arith.constant 0 : i32
    return %c0_i32, %arg1 : i32, i32
  }
  func.func @transform_3(%arg0: i32, %arg1: i32, %arg2: i32) -> (i32, i32) {
    %c0_i32 = arith.constant 0 : i32
    return %arg0, %arg1 : i32, i32
  }
}

</mosaic_0001>

<bundles_post_ra>
// kernel: tpu_custom_call.1
= control target key start
LH: loop header
LB: loop body
LE: loop exit
PB: predicated region body
PF: predicated region fallthrough
CT: control target
= control target key end

     0   :  { %8 = vsyncpa [#allocation4], 0  ;;  %s445_s0 = inlined_call_operand.hbm [shape: bf16[8,256], index: 0, kind: input, shape index: {}]   ;;  %s446_s1 = inlined_call_operand.hbm [shape: bf16[256,128], index: 1, kind: input, shape index: {}]   ;;  %s447_s2 = inlined_call_operand.vmem [shape: f32[1,128], index: 2, kind: input, shape index: {}]   ;;  %s448_s3 = inlined_call_operand.hbm [shape: f32[8,128], index: 3, kind: output, shape index: {}]  }
   0x1   :  { %9 = vsyncpa [#allocation7], 0 }
   0x2   :  { %10 = vsyncpa [#allocation5], 0  ;;  %s16_s14 = sshll.u32 %s445_s0, 4  ;;  %s408_s15 = smov [#allocation3]   ;;  %s17_s14 = int_to_ptr.hbm [resolvable:$true] %s16_s14 }
   0x3   :  { %s18_s16 = sshll.u32 %s408_s15, 4  ;;  %s26_s19 = sshll.u32 %s446_s1, 4  ;;  %s19_s16 = int_to_ptr.vmem [resolvable:$true] %s18_s16  ;;  %s27_s19 = int_to_ptr.hbm [resolvable:$true] %s26_s19 }
   0x4   :  { %21 = dma.hbm_to_vmem [thread:$0]  %s17_s14, 128, %s19_s16, [#allocation4]  }
   0x5   :  { %s409_s20 = smov [#allocation6]   ;;  %s410_s22 = smov 64  }
   0x6   :  { %s28_s21 = sshll.u32 %s409_s20, 4  ;;  %s411_s23 = smov 4   ;;  %s29_s21 = int_to_ptr.vmem [resolvable:$true] %s28_s21 }
   0x7   :  { %34 = dma.hbm_to_vmem [thread:$0]  %s27_s19, 2048, %s29_s21, [#allocation7], %s410_s22, %s410_s22, %s411_s23  }
   0x8   :  { %402 = dma.done.wait [#allocation4], 128  }
   0x9   :  { %403 = vsyncadd [#allocation4], 4294967168 }
   0xa   :  { %404 = dma.done.wait [#allocation7], 2048  }
   0xb   :  { %405 = vsyncadd [#allocation7], 4294965248  ;;  %v315_v0 = vld [vmem:[#allocation6 + $0x38] sm:$0xff]  ;;  %v314_v2 = vld [vmem:[#allocation6 + $0x30] sm:$0xff]  ;;  %s412_s24 = smov [#allocation8]   ;;  %s233_s28 = sshll.u32 %s448_s3, 4  ;;  %s234_s28 = int_to_ptr.hbm [resolvable:$true] %s233_s28 }
   0xc   :  { %v323_v1 = vld [vmem:[#allocation6 + $0x78] sm:$0xff]  ;;  %187 = vmatpush.bf16.msra.mxu0 %v315_v0  ;;  %v322_v3 = vld [vmem:[#allocation6 + $0x70] sm:$0xff]  ;;  %v313_v4 = vld [vmem:[#allocation6 + $0x28] sm:$0xff]  ;;  %s231_s25 = sshll.u32 %s412_s24, 4  ;;  %s232_s25 = int_to_ptr.vmem [resolvable:$true] %s231_s25 }
   0xd   :  { %200 = vmatpush.bf16.msra.mxu1 %v323_v1  ;;  %v321_v5 = vld [vmem:[#allocation6 + $0x68] sm:$0xff]  ;;  %v312_v6 = vld [vmem:[#allocation6 + $0x20] sm:$0xff]  ;;  %v311_v8 = vld [vmem:[#allocation6 + $0x18] sm:$0xff] }
   0xe   :  { %v320_v7 = vld [vmem:[#allocation6 + $0x60] sm:$0xff]  ;;  %v319_v9 = vld [vmem:[#allocation6 + $0x58] sm:$0xff]  ;;  %v310_v10 = vld [vmem:[#allocation6 + $0x10] sm:$0xff] }
   0xf   :  { %v318_v11 = vld [vmem:[#allocation6 + $0x50] sm:$0xff]  ;;  %v309_v12 = vld [vmem:[#allocation6 + $0x8] sm:$0xff]  ;;  %v51_v14 = vld [vmem:[#allocation3] sm:$0xff] }
  0x10   :  { %188 = vmatpush.bf16.msra.mxu0 %v314_v2  ;;  %v317_v13 = vld [vmem:[#allocation6 + $0x48] sm:$0xff]  ;;  %v85_v15 = vunpack.c.l.b16 %v51_v14  ;;  %v86_v16 = vunpack.c.h.b16 %v51_v14  ;;  %v308_v17 = vld [vmem:[#allocation6] sm:$0xff]  ;;  %v329_v21 = vld [vmem:[%s447_s2] ss:$0 sm:$0xff] }
  0x11   :  { %201 = vmatpush.bf16.msra.mxu1 %v322_v3  ;;  %v316_v18 = vld [vmem:[#allocation6 + $0x40] sm:$0xff] }
  0x12   :  { %v87_v19 = vpack.c.b16 %v85_v15, %v85_v15  ;;  %v88_v20 = vpack.c.b16 %v86_v16, %v86_v16 }
  0x14   :  { %189 = vmatpush.bf16.msra.mxu0 %v313_v4 }
  0x15   :  { %202 = vmatpush.bf16.msra.mxu1 %v321_v5 }
  0x18   :  { %190 = vmatpush.bf16.msra.mxu0 %v312_v6 }
  0x19   :  { %203 = vmatpush.bf16.msra.mxu1 %v320_v7 }
  0x1c   :  { %191 = vmatpush.bf16.msra.mxu0 %v311_v8 }
  0x1d   :  { %204 = vmatpush.bf16.msra.mxu1 %v319_v9 }
  0x20   :  { %192 = vmatpush.bf16.msra.mxu0 %v310_v10 }
  0x21   :  { %205 = vmatpush.bf16.msra.mxu1 %v318_v11 }
  0x24   :  { %193 = vmatpush.bf16.msra.mxu0 %v309_v12 }
  0x25   :  { %206 = vmatpush.bf16.msra.mxu1 %v317_v13 }
  0x28   :  { %194 = vmatpush.bf16.msra.mxu0 %v308_v17 }
  0x29   :  { %207 = vmatpush.bf16.msra.mxu1 %v316_v18 }
  0x2b   :  { %195 = vmatmul.bf16.vlgmr.msra.gmra.mxu0 %v87_v19 }
  0x2c   :  { %208 = vmatmul.bf16.vlgmr.msra.gmra.mxu1 %v88_v20 }
  0xa8   :  { %v196_v22 = vpop.f32.mrf.mxu0 }
  0xa9   :  { %v209_v23 = vpop.f32.mrf.mxu1 }
  0xaa   :  { %v210_v24 = vadd.f32 %v209_v23, %v196_v22 }
  0xac   :  { %v223_v25 = vadd.f32 %v329_v21, %v210_v24 }
  0xae   :  { %v224_v26 = vmax.f32 %v223_v25, 0.0 }
  0xb0   :  { %225 = vst [vmem:[#allocation8] sm:$0xff] %v224_v26  ;;  %v198_v27 = vpop.f32.mrf.mxu0 }
  0xb1   :  { %v211_v28 = vpop.f32.mrf.mxu1  ;;  %236 = dma.vmem_to_hbm [thread:$0]  %s232_s25, 128, %s234_s28, [#allocation5]  }
  0xb2   :  { %406 = dma.done.wait [#allocation5], 128  }
  0xb3   :  { %407 = vsyncadd [#allocation5], 4294967168 }
  0xb4   :  { %241 = vsyncpa [#allocation4], 1 }
  0xb5   :  { %242 = vsyncpa [#allocation7], 1 }
  0xb6   :  { %243 = vsyncpa [#allocation5], 1 }

</bundles_post_ra>
